<compile_context>
chip_gen: v7x
topology: tpu7x:2x2x1
jax: 0.10.0
libtpu: 0.0.40
codegen_flags: <defaults>
</compile_context>

<pallas_src>
import jax
import jax.numpy as jnp
from jax.experimental import pallas as pl
from jax.experimental.pallas import tpu as pltpu


def _make_st_gcn_kernel(Kt, pad, NB):
    """Kernel over one batch block of NB samples, each a (C, T*V) lane-dense slab."""

    def kernel(x_ref, abd_ref, s_ref, wg_ref, wt_ref, vec_ref, alpha_ref, out_ref):
        alpha = alpha_ref[0]                      # PReLU slope (SMEM scalar)
        A_bd = abd_ref[...]                       # (TV, TV) block-diagonal adjacency
        Wg = wg_ref[...]                          # (Cout, Cin) 1x1 conv weight

        # packed per-channel vectors, each (Cout, 1): broadcast along lanes
        bg = vec_ref[0]
        s1 = vec_ref[1]
        b1 = vec_ref[2]
        bt = vec_ref[3]
        s2 = vec_ref[4]
        b2 = vec_ref[5]

        for i in range(NB):                       # static unroll over samples in block
            x = x_ref[i]                          # (Cin, TV), lanes = T*V = 128

            # --- gcn.conv: 1x1 conv = channel matmul, output lanes = TV ---
            y1 = jnp.dot(Wg, x, preferred_element_type=jnp.float32) + bg

            # --- graph contraction einsum('nctv,tvw->nctw') == y1 @ block_diag(A) ---
            y2 = jnp.dot(y1, A_bd, preferred_element_type=jnp.float32)

            # --- tcn: BatchNorm (inference affine) + PReLU ---
            z = y2 * s1 + b1
            z = jnp.where(z >= 0, z, alpha * z)

            # --- temporal conv (Kt, 1), 'same' zero padding along T ---
            # Shifted copies of z are produced in-registers via precomputed 0/1
            # shift matrices on the MXU (no VMEM scratch, no masked stores).
            acc = None
            for kt in range(Kt):                  # static, small Kt
                if kt == pad:
                    zs = z                        # zero shift: identity
                else:
                    zs = jnp.dot(z, s_ref[kt], preferred_element_type=jnp.float32)
                term = jnp.dot(wt_ref[kt], zs, preferred_element_type=jnp.float32)
                acc = term if acc is None else acc + term

            # --- BN2 (inference) + Dropout(p=0)=identity + identity residual ---
            u = (acc + bt) * s2 + b2
            out_ref[i] = (u + x).astype(out_ref.dtype)

    return kernel


def st_gcn_forward(x_nchw, A, params, batch_block=None):
    """x_nchw: (N, Cin, T, V) float32, A: (T, V, V) float32 (K == T here)."""
    N, Cin, T, V = x_nchw.shape
    Cout = params['Wg'].shape[0]
    Kt = params['Wt'].shape[0]
    pad = (Kt - 1) // 2
    TV = T * V
    assert Cin == Cout, "identity residual path requires in_ch == out_ch"

    # NCHW-native, lane-dense: collapse (T, V) into one lane axis (free reshape,
    # no HBM transpose round trips).
    x_flat = x_nchw.reshape(N, Cin, TV).astype(jnp.float32)

    # Block-diagonal adjacency so the per-timestep graph contraction becomes a
    # single (C, TV) @ (TV, TV) matmul with a 128-wide contraction.
    A = A.astype(jnp.float32)
    A_bd = jnp.zeros((TV, TV), jnp.float32)
    for t in range(T):
        A_bd = A_bd.at[t * V:(t + 1) * V, t * V:(t + 1) * V].set(A[t])

    # 0/1 shift matrices for the (Kt,1) 'same' temporal conv:
    #   (z @ S[kt])[c, t*V+v] == z[c, (t+kt-pad)*V+v]  (zero outside [0, T)).
    S_all = jnp.stack(
        [jnp.eye(TV, k=-(kt - pad) * V, dtype=jnp.float32) for kt in range(Kt)],
        axis=0)                                                      # (Kt, TV, TV)

    # Pack the six per-channel vectors into one operand: single DMA, (Cout, 1)
    # columns broadcast along lanes inside the kernel.
    vecs = jnp.stack(
        [params['bg'], params['scale1'], params['shift1'],
         params['bt'], params['scale2'], params['shift2']],
        axis=0).astype(jnp.float32).reshape(6, Cout, 1)

    # Batch blocking: amortize per-grid-step pipeline overhead for large N while
    # keeping >= 2 parallel grid steps (both v7x TensorCores busy) and staying
    # well under the scoped-VMEM budget (blocks are double-buffered).
    if batch_block is None:
        per_sample = (Cin + Cout) * TV * 4
        nb = max(1, min(max(N // 2, 1), (2 << 20) // per_sample))
        while N % nb:
            nb -= 1
        batch_block = max(nb, 1)
    NB = batch_block
    grid = (N // NB,)

    kernel = _make_st_gcn_kernel(Kt, pad, NB)

    out_flat = pl.pallas_call(
        kernel,
        out_shape=jax.ShapeDtypeStruct((N, Cout, TV), jnp.float32),
        grid=grid,
        in_specs=[
            pl.BlockSpec((NB, Cin, TV), lambda n: (n, 0, 0)),       # x (lane-dense)
            pl.BlockSpec((TV, TV), lambda n: (0, 0)),               # block-diag A
            pl.BlockSpec((Kt, TV, TV), lambda n: (0, 0, 0)),        # shift matrices
            pl.BlockSpec((Cout, Cin), lambda n: (0, 0)),            # gcn 1x1 weight
            pl.BlockSpec((Kt, Cout, Cout), lambda n: (0, 0, 0)),    # temporal conv W
            pl.BlockSpec((6, Cout, 1), lambda n: (0, 0, 0)),        # packed per-ch vecs
            pl.BlockSpec(memory_space=pltpu.MemorySpace.SMEM),      # PReLU alpha
        ],
        out_specs=pl.BlockSpec((NB, Cout, TV), lambda n: (n, 0, 0)),
        compiler_params=pltpu.CompilerParams(dimension_semantics=("parallel",)),
    )(x_flat, A_bd, S_all, params['Wg'], params['Wt'], vecs, params['alpha'])

    out_nchw = out_flat.reshape(N, Cout, T, V)                      # free reshape
    return out_nchw, A


def init_params(key, Cin, Cout, Kt, eps=1e-5):
    ks = jax.random.split(key, 12)
    p = {}
    p['Wg'] = 0.3 * jax.random.normal(ks[0], (Cout, Cin), jnp.float32)   # [o, c]
    p['bg'] = 0.1 * jax.random.normal(ks[1], (Cout,), jnp.float32)
    gamma1 = 1.0 + 0.1 * jax.random.normal(ks[2], (Cout,), jnp.float32)
    beta1 = 0.1 * jax.random.normal(ks[3], (Cout,), jnp.float32)
    rm1 = 0.1 * jax.random.normal(ks[4], (Cout,), jnp.float32)
    rv1 = 1.0 + 0.1 * jax.random.uniform(ks[5], (Cout,), jnp.float32)
    p['scale1'] = gamma1 / jnp.sqrt(rv1 + eps)
    p['shift1'] = beta1 - rm1 * p['scale1']
    p['alpha'] = jnp.array([0.25], jnp.float32)          # PReLU default init
    p['Wt'] = 0.3 * jax.random.normal(ks[6], (Kt, Cout, Cout), jnp.float32)  # [kt, o, c]
    p['bt'] = 0.1 * jax.random.normal(ks[7], (Cout,), jnp.float32)
    gamma2 = 1.0 + 0.1 * jax.random.normal(ks[8], (Cout,), jnp.float32)
    beta2 = 0.1 * jax.random.normal(ks[9], (Cout,), jnp.float32)
    rm2 = 0.1 * jax.random.normal(ks[10], (Cout,), jnp.float32)
    rv2 = 1.0 + 0.1 * jax.random.uniform(ks[11], (Cout,), jnp.float32)
    p['scale2'] = gamma2 / jnp.sqrt(rv2 + eps)
    p['shift2'] = beta2 - rm2 * p['scale2']
    return p


def reference_forward(x, A, p):
    """Pure-JAX mirror of the PyTorch forward in NCHW, for verification."""
    N, Cin, T, V = x.shape
    Kt = p['Wt'].shape[0]
    pad = (Kt - 1) // 2
    y1 = jnp.einsum('nctv,oc->notv', x, p['Wg']) + p['bg'][None, :, None, None]
    y2 = jnp.einsum('nctv,tvw->nctw', y1, A)
    z = y2 * p['scale1'][None, :, None, None] + p['shift1'][None, :, None, None]
    z = jnp.where(z >= 0, z, p['alpha'][0] * z)
    zp = jnp.pad(z, ((0, 0), (0, 0), (pad, pad), (0, 0)))
    u = jnp.zeros_like(y2) + p['bt'][None, :, None, None]
    for kt in range(Kt):
        u = u + jnp.einsum('nctv,oc->notv', zp[:, :, kt:kt + T, :], p['Wt'][kt])
    u = u * p['scale2'][None, :, None, None] + p['shift2'][None, :, None, None]
    return u + x


if __name__ == "__main__":
    key = jax.random.PRNGKey(0)
    k_x, k_a, k_p = jax.random.split(key, 3)

    # st_gcn(in_channels=4, out_channels=4, kernel_size=(3, T)), T == A.shape[0]
    N, Cin, Cout, T, V, Kt = 2, 4, 4, 8, 16, 3     # T*V = 128 (one full lane row)

    x = jax.random.normal(k_x, (N, Cin, T, V), jnp.float32)
    A = 0.2 * jax.random.normal(k_a, (T, V, V), jnp.float32)   # (K, V, V), K == T
    params = init_params(k_p, Cin, Cout, Kt)

    out, A_out = st_gcn_forward(x, A, params)
    out = jax.block_until_ready(out)

    ref = reference_forward(x, A, params)
    assert out.shape == (N, Cout, T, V)
    assert jnp.allclose(out, ref, rtol=1e-4, atol=1e-4), "mismatch vs reference"
    print("KERNEL_OK")
</pallas_src>

<mosaic_0001>
module attributes {stable_mosaic.version = 11 : i64} {
  func.func @kernel(%arg0: i32, %arg1: memref<1x4x128xf32, #tpu.memory_space<vmem>>, %arg2: memref<128x128xf32, #tpu.memory_space<vmem>>, %arg3: memref<3x128x128xf32, #tpu.memory_space<vmem>>, %arg4: memref<4x4xf32, #tpu.memory_space<vmem>>, %arg5: memref<3x4x4xf32, #tpu.memory_space<vmem>>, %arg6: memref<6x4x1xf32, #tpu.memory_space<vmem>>, %arg7: memref<1xf32, #tpu.memory_space<smem>>, %arg8: memref<1x4x128xf32, #tpu.memory_space<vmem>>) attributes {dimension_semantics = [#tpu.dimension_semantics<parallel>], iteration_bounds = array<i64: 2>, scalar_prefetch = 0 : i64, scratch_operands = 0 : i64, tpu.core_type = #tpu.core_type<tc>, window_params = [{transform_indices = @transform_0, window_bounds = array<i64: 1, 4, 128>}, {pipeline_mode = #tpu.pipeline_mode<synchronous>, transform_indices = @transform_1, window_bounds = array<i64: 128, 128>}, {pipeline_mode = #tpu.pipeline_mode<synchronous>, transform_indices = @transform_2, window_bounds = array<i64: 3, 128, 128>}, {pipeline_mode = #tpu.pipeline_mode<synchronous>, transform_indices = @transform_3, window_bounds = array<i64: 4, 4>}, {pipeline_mode = #tpu.pipeline_mode<synchronous>, transform_indices = @transform_4, window_bounds = array<i64: 3, 4, 4>}, {pipeline_mode = #tpu.pipeline_mode<synchronous>, transform_indices = @transform_5, window_bounds = array<i64: 6, 4, 1>}, {transform_indices = @transform_6, window_bounds = array<i64: 1>}, {transform_indices = @transform_7, window_bounds = array<i64: 1, 4, 128>}]} {
    %c0 = arith.constant 0 : index
    %0 = memref.load %arg7[%c0] : memref<1xf32, #tpu.memory_space<smem>>
    %c0_0 = arith.constant 0 : index
    %c0_1 = arith.constant 0 : index
    %1 = vector.load %arg2[%c0_0, %c0_1] : memref<128x128xf32, #tpu.memory_space<vmem>>, vector<128x128xf32>
    %c0_2 = arith.constant 0 : index
    %c0_3 = arith.constant 0 : index
    %2 = vector.load %arg4[%c0_2, %c0_3] : memref<4x4xf32, #tpu.memory_space<vmem>>, vector<4x4xf32>
    %c0_4 = arith.constant 0 : index
    %c0_5 = arith.constant 0 : index
    %c0_6 = arith.constant 0 : index
    %3 = vector.load %arg6[%c0_4, %c0_5, %c0_6] : memref<6x4x1xf32, #tpu.memory_space<vmem>>, vector<1x4x1xf32>
    %4 = vector.shape_cast %3 : vector<1x4x1xf32> to vector<4x1xf32>
    %c1 = arith.constant 1 : index
    %c0_7 = arith.constant 0 : index
    %c0_8 = arith.constant 0 : index
    %5 = vector.load %arg6[%c1, %c0_7, %c0_8] : memref<6x4x1xf32, #tpu.memory_space<vmem>>, vector<1x4x1xf32>
    %6 = vector.shape_cast %5 : vector<1x4x1xf32> to vector<4x1xf32>
    %c2 = arith.constant 2 : index
    %c0_9 = arith.constant 0 : index
    %c0_10 = arith.constant 0 : index
    %7 = vector.load %arg6[%c2, %c0_9, %c0_10] : memref<6x4x1xf32, #tpu.memory_space<vmem>>, vector<1x4x1xf32>
    %8 = vector.shape_cast %7 : vector<1x4x1xf32> to vector<4x1xf32>
    %c3 = arith.constant 3 : index
    %c0_11 = arith.constant 0 : index
    %c0_12 = arith.constant 0 : index
    %9 = vector.load %arg6[%c3, %c0_11, %c0_12] : memref<6x4x1xf32, #tpu.memory_space<vmem>>, vector<1x4x1xf32>
    %10 = vector.shape_cast %9 : vector<1x4x1xf32> to vector<4x1xf32>
    %c4 = arith.constant 4 : index
    %c0_13 = arith.constant 0 : index
    %c0_14 = arith.constant 0 : index
    %11 = vector.load %arg6[%c4, %c0_13, %c0_14] : memref<6x4x1xf32, #tpu.memory_space<vmem>>, vector<1x4x1xf32>
    %12 = vector.shape_cast %11 : vector<1x4x1xf32> to vector<4x1xf32>
    %c5 = arith.constant 5 : index
    %c0_15 = arith.constant 0 : index
    %c0_16 = arith.constant 0 : index
    %13 = vector.load %arg6[%c5, %c0_15, %c0_16] : memref<6x4x1xf32, #tpu.memory_space<vmem>>, vector<1x4x1xf32>
    %14 = vector.shape_cast %13 : vector<1x4x1xf32> to vector<4x1xf32>
    %c0_17 = arith.constant 0 : index
    %c0_18 = arith.constant 0 : index
    %c0_19 = arith.constant 0 : index
    %15 = vector.load %arg1[%c0_17, %c0_18, %c0_19] : memref<1x4x128xf32, #tpu.memory_space<vmem>>, vector<1x4x128xf32>
    %16 = vector.shape_cast %15 : vector<1x4x128xf32> to vector<4x128xf32>
    %cst = arith.constant dense<0.000000e+00> : vector<4x128xf32>
    %17 = tpu.matmul %2, %16, %cst {dimension_numbers = #tpu.dot_dimension_numbers<[1], [0], [0], [1], [0, 0, 1, 1], [], []>} : vector<4x4xf32>, vector<4x128xf32>, vector<4x128xf32> -> vector<4x128xf32>
    %18 = vector.broadcast %4 : vector<4x1xf32> to vector<4x128xf32>
    %19 = arith.addf %17, %18 : vector<4x128xf32>
    %cst_20 = arith.constant dense<0.000000e+00> : vector<4x128xf32>
    %20 = tpu.matmul %19, %1, %cst_20 {dimension_numbers = #tpu.dot_dimension_numbers<[1], [0], [0], [1], [0, 0, 1, 1], [], []>} : vector<4x128xf32>, vector<128x128xf32>, vector<4x128xf32> -> vector<4x128xf32>
    %21 = vector.broadcast %6 : vector<4x1xf32> to vector<4x128xf32>
    %22 = arith.mulf %20, %21 : vector<4x128xf32>
    %23 = vector.broadcast %8 : vector<4x1xf32> to vector<4x128xf32>
    %24 = arith.addf %22, %23 : vector<4x128xf32>
    %cst_21 = arith.constant 0.000000e+00 : f32
    %25 = vector.broadcast %cst_21 : f32 to vector<4x128xf32>
    %26 = arith.cmpf oge, %24, %25 : vector<4x128xf32>
    %27 = vector.broadcast %0 : f32 to vector<4x128xf32>
    %28 = arith.mulf %27, %24 : vector<4x128xf32>
    %29 = arith.select %26, %24, %28 : vector<4x128xi1>, vector<4x128xf32>
    %c0_22 = arith.constant 0 : index
    %c0_23 = arith.constant 0 : index
    %c0_24 = arith.constant 0 : index
    %30 = vector.load %arg3[%c0_22, %c0_23, %c0_24] : memref<3x128x128xf32, #tpu.memory_space<vmem>>, vector<1x128x128xf32>
    %31 = vector.shape_cast %30 : vector<1x128x128xf32> to vector<128x128xf32>
    %cst_25 = arith.constant dense<0.000000e+00> : vector<4x128xf32>
    %32 = tpu.matmul %29, %31, %cst_25 {dimension_numbers = #tpu.dot_dimension_numbers<[1], [0], [0], [1], [0, 0, 1, 1], [], []>} : vector<4x128xf32>, vector<128x128xf32>, vector<4x128xf32> -> vector<4x128xf32>
    %c0_26 = arith.constant 0 : index
    %c0_27 = arith.constant 0 : index
    %c0_28 = arith.constant 0 : index
    %33 = vector.load %arg5[%c0_26, %c0_27, %c0_28] : memref<3x4x4xf32, #tpu.memory_space<vmem>>, vector<1x4x4xf32>
    %34 = vector.shape_cast %33 : vector<1x4x4xf32> to vector<4x4xf32>
    %cst_29 = arith.constant dense<0.000000e+00> : vector<4x128xf32>
    %35 = tpu.matmul %34, %32, %cst_29 {dimension_numbers = #tpu.dot_dimension_numbers<[1], [0], [0], [1], [0, 0, 1, 1], [], []>} : vector<4x4xf32>, vector<4x128xf32>, vector<4x128xf32> -> vector<4x128xf32>
    %c1_30 = arith.constant 1 : index
    %c0_31 = arith.constant 0 : index
    %c0_32 = arith.constant 0 : index
    %36 = vector.load %arg5[%c1_30, %c0_31, %c0_32] : memref<3x4x4xf32, #tpu.memory_space<vmem>>, vector<1x4x4xf32>
    %37 = vector.shape_cast %36 : vector<1x4x4xf32> to vector<4x4xf32>
    %cst_33 = arith.constant dense<0.000000e+00> : vector<4x128xf32>
    %38 = tpu.matmul %37, %29, %cst_33 {dimension_numbers = #tpu.dot_dimension_numbers<[1], [0], [0], [1], [0, 0, 1, 1], [], []>} : vector<4x4xf32>, vector<4x128xf32>, vector<4x128xf32> -> vector<4x128xf32>
    %39 = arith.addf %35, %38 : vector<4x128xf32>
    %c2_34 = arith.constant 2 : index
    %c0_35 = arith.constant 0 : index
    %c0_36 = arith.constant 0 : index
    %40 = vector.load %arg3[%c2_34, %c0_35, %c0_36] : memref<3x128x128xf32, #tpu.memory_space<vmem>>, vector<1x128x128xf32>
    %41 = vector.shape_cast %40 : vector<1x128x128xf32> to vector<128x128xf32>
    %cst_37 = arith.constant dense<0.000000e+00> : vector<4x128xf32>
    %42 = tpu.matmul %29, %41, %cst_37 {dimension_numbers = #tpu.dot_dimension_numbers<[1], [0], [0], [1], [0, 0, 1, 1], [], []>} : vector<4x128xf32>, vector<128x128xf32>, vector<4x128xf32> -> vector<4x128xf32>
    %c2_38 = arith.constant 2 : index
    %c0_39 = arith.constant 0 : index
    %c0_40 = arith.constant 0 : index
    %43 = vector.load %arg5[%c2_38, %c0_39, %c0_40] : memref<3x4x4xf32, #tpu.memory_space<vmem>>, vector<1x4x4xf32>
    %44 = vector.shape_cast %43 : vector<1x4x4xf32> to vector<4x4xf32>
    %cst_41 = arith.constant dense<0.000000e+00> : vector<4x128xf32>
    %45 = tpu.matmul %44, %42, %cst_41 {dimension_numbers = #tpu.dot_dimension_numbers<[1], [0], [0], [1], [0, 0, 1, 1], [], []>} : vector<4x4xf32>, vector<4x128xf32>, vector<4x128xf32> -> vector<4x128xf32>
    %46 = arith.addf %39, %45 : vector<4x128xf32>
    %47 = vector.broadcast %10 : vector<4x1xf32> to vector<4x128xf32>
    %48 = arith.addf %46, %47 : vector<4x128xf32>
    %49 = vector.broadcast %12 : vector<4x1xf32> to vector<4x128xf32>
    %50 = arith.mulf %48, %49 : vector<4x128xf32>
    %51 = vector.broadcast %14 : vector<4x1xf32> to vector<4x128xf32>
    %52 = arith.addf %50, %51 : vector<4x128xf32>
    %53 = arith.addf %52, %16 : vector<4x128xf32>
    %c0_42 = arith.constant 0 : index
    %c0_43 = arith.constant 0 : index
    %c0_44 = arith.constant 0 : index
    %54 = vector.load %arg8[%c0_42, %c0_43, %c0_44] : memref<1x4x128xf32, #tpu.memory_space<vmem>>, vector<1x4x128xf32>
    %55 = vector.shape_cast %54 : vector<1x4x128xf32> to vector<4x128xf32>
    %56 = vector.shape_cast %53 : vector<4x128xf32> to vector<1x4x128xf32>
    tpu.vector_store %arg8[%c0_42, %c0_43, %c0_44], %56 {strides = array<i32>} : memref<1x4x128xf32, #tpu.memory_space<vmem>>, vector<1x4x128xf32>,
    return
  }
  func.func @transform_0(%arg0: i32) -> (i32, i32, i32) {
    %c0_i32 = arith.constant 0 : i32
    %c0_i32_0 = arith.constant 0 : i32
    %c0_i32_1 = arith.constant 0 : i32
    return %arg0, %c0_i32, %c0_i32_0 : i32, i32, i32
  }
  func.func @transform_1(%arg0: i32) -> (i32, i32) {
    %c0_i32 = arith.constant 0 : i32
    %c0_i32_0 = arith.constant 0 : i32
    %c0_i32_1 = arith.constant 0 : i32
    return %c0_i32, %c0_i32_0 : i32, i32
  }
  func.func @transform_2(%arg0: i32) -> (i32, i32, i32) {
    %c0_i32 = arith.constant 0 : i32
    %c0_i32_0 = arith.constant 0 : i32
    %c0_i32_1 = arith.constant 0 : i32
    %c0_i32_2 = arith.constant 0 : i32
    return %c0_i32, %c0_i32_0, %c0_i32_1 : i32, i32, i32
  }
  func.func @transform_3(%arg0: i32) -> (i32, i32) {
    %c0_i32 = arith.constant 0 : i32
    %c0_i32_0 = arith.constant 0 : i32
    %c0_i32_1 = arith.constant 0 : i32
    return %c0_i32, %c0_i32_0 : i32, i32
  }
  func.func @transform_4(%arg0: i32) -> (i32, i32, i32) {
    %c0_i32 = arith.constant 0 : i32
    %c0_i32_0 = arith.constant 0 : i32
    %c0_i32_1 = arith.constant 0 : i32
    %c0_i32_2 = arith.constant 0 : i32
    return %c0_i32, %c0_i32_0, %c0_i32_1 : i32, i32, i32
  }
  func.func @transform_5(%arg0: i32) -> (i32, i32, i32) {
    %c0_i32 = arith.constant 0 : i32
    %c0_i32_0 = arith.constant 0 : i32
    %c0_i32_1 = arith.constant 0 : i32
    %c0_i32_2 = arith.constant 0 : i32
    return %c0_i32, %c0_i32_0, %c0_i32_1 : i32, i32, i32
  }
  func.func @transform_6(%arg0: i32) -> i32 {
    %c0_i32 = arith.constant 0 : i32
    %c0_i32_0 = arith.constant 0 : i32
    return %c0_i32 : i32
  }
  func.func @transform_7(%arg0: i32) -> (i32, i32, i32) {
    %c0_i32 = arith.constant 0 : i32
    %c0_i32_0 = arith.constant 0 : i32
    %c0_i32_1 = arith.constant 0 : i32
    return %arg0, %c0_i32, %c0_i32_0 : i32, i32, i32
  }
}

</mosaic_0001>

<bundles_post_ra>
// kernel: tpu_custom_call.1
= control target key start
LH: loop header
LB: loop body
LE: loop exit
PB: predicated region body
PF: predicated region fallthrough
CT: control target
= control target key end

     0   :  { %s1815_s0 = inlined_call_operand.vmem [shape: f32[2,4,128], index: 0, kind: input, shape index: {}]   ;;  %s1816_s1 = inlined_call_operand.hbm [shape: f32[128,128], index: 1, kind: input, shape index: {}]   ;;  %s1817_s2 = inlined_call_operand.hbm [shape: f32[3,128,128], index: 2, kind: input, shape index: {}]   ;;  %s1818_s3 = inlined_call_operand.vmem [shape: f32[4,4], index: 3, kind: input, shape index: {}]   ;;  %s1819_s4 = inlined_call_operand.vmem [shape: f32[3,4,4], index: 4, kind: input, shape index: {}]   ;;  %s1820_s5 = inlined_call_operand.vmem [shape: f32[6,4,1], index: 5, kind: input, shape index: {}]   ;;  %s1821_s6 = inlined_call_operand.<no memory space> [shape: f32[1], index: 6, kind: input, shape index: {}]   ;;  %s1822_s7 = inlined_call_operand.hbm [shape: f32[2,4,128], index: 7, kind: output, shape index: {}]  }
   0x1   :  { %12 = sst [smem:[#allocation2]] %s1821_s6 }
   0x2   :  { %13 = vsyncpa [#allocation4], 0 }
   0x3   :  { %14 = vsyncpa [#allocation7], 0 }
   0x4   :  { %15 = vsyncpa [#allocation5], 0 }
   0x5   :  { %17 = vsyncpa [#allocation5 + $0x1], 0  ;;  %s1559_s26 = smov 0   ;;  %s1561_s27 = smov 0  }
   0x6   :  { %s1563_s28 = smov 0   ;;  %s1565_s29 = smov 0  }
   0x7 LB: > { %s1580_s6 = sadd.s32 4294967295, %s1505_s29   ;;  %s1026_s30 = sadd.s32 4294967294, %s1505_s29   ;;  %s1505_s29 = sphi %s1565_s29, %s1840_s29   ;;  %s1501_s28 = sphi %s1563_s28, %s1839_s28   ;;  %s1497_s27 = sphi %s1561_s27, %s1838_s27   ;;  %s1493_s26 = sphi %s1559_s26, %s1837_s26  }
   0x8   : > { %s1584_s8 = sadd.s32 1, %s1505_s29   ;;  %s182_s9 = sadd.s32 1, %s1501_s28 }
   0x9   : > { %s179_s10 = ssub.s32 %s1505_s29, %s1584_s8  ;;  %p192_p0 = scmp.ne.s32.totalorder %s1501_s28, %s1497_s27 }
   0xa   : > { %p180_p1 = scmp.eq.s32.totalorder %s179_s10, 0  ;;  %p193_p2 = scmp.eq.s32.totalorder %s1580_s6, 1 }
   0xb   : > { %p198_p3 = scmp.ne.s32.totalorder %s1497_s27, %s1493_s26  ;;  %p199_p4 = scmp.eq.s32.totalorder %s1026_s30, 1 }
   0xc   : > { %s1595_s11 = scalar_select %p180_p1, %s1501_s28, %s182_s9  }
   0xd   : > { %p1597_p5 = por %p193_p2, %p192_p0  ;;  %p1601_p6 = por %p199_p4, %p198_p3 }
   0xe   : > { %p1027_p7 = scmp.ge.s32.totalorder %s1505_s29, 1  ;;  %p206_p8 = scmp.lt.s32.totalorder %s1505_s29, 3 }
   0xf   : > { %s1826_s12 = scalar_select %p1597_p5, 1, 0 }
  0x10   : > { %s1827_s13 = scalar_select %p1601_p6, 1, 0 }
  0x11   : > { %p1823_p9 = scmp.eq.s32.totalorder %s1580_s6, 0  ;;  %p1608_p10 = pnand %p1027_p7, %p206_p8 }
  0x12   : > { %s1507_s15 = smov [#allocation3]   ;;  %s1508_s18 = smov [#allocation6]  }
  0x13   : > { %s1828_s14 = scalar_select %p1608_p10, 1, 0 }
  0x14   : > { %s218_s16 = sshll.u32 %s1507_s15, 4  ;;  %p1321_p11 = pneg %p1608_p10  ;;  %s219_s16 = int_to_ptr.vmem [resolvable:$true] %s218_s16 }
  0x15   : > { %s231_s19 = sshll.u32 %s1508_s18, 4  ;;  %s1379_s22 = scalar_lea.hbm %s1816_s1, 2048  ;;  %s1620_s19 = int_to_ptr.vmem [resolvable:$true] %s231_s19 }
  0x16   : > { %p1616_p12 = pnand %p1823_p9, %p1321_p11  ;;  %p1380_p13 = scmp.ne.s32.totalorder %s1816_s1, %s1379_s22 }
  0x17   : > { %p1386_p3 = scmp.lt.u32.totalorder %s1379_s22, %s1816_s1 }
  0x18   : > { %p1381_p0 = pneg %p1616_p12 }
  0x1a   : > { %p1382_p1 = pnand %p1381_p0, %p1380_p13 }
  0x1c   : > { %p1383_p2 = pneg %p1382_p1 }
  0x1e   : > { %p1388_p4 = pnand %p1386_p3, %p1383_p2 }
  0x20   : > { %1391 = shalt.err (!%p1388_p4)
}
  0x21   : > { %s1392_s9 = scalar_lea.vmem %s219_s16, 2048  ;;  %p1400_p9 = scmp.lt.s32.totalorder %s219_s16, %s219_s16 }
  0x22   : > { %p1393_p7 = scmp.ne.s32.totalorder %s219_s16, %s1392_s9  ;;  %p1401_p6 = scmp.lt.s32.totalorder %s1392_s9, %s1392_s9 }
  0x24   : > { %p1395_p8 = pnand %p1393_p7, %p1381_p0  ;;  %p1402_p5 = por %p1401_p6, %p1400_p9 }
  0x26   : > { %p1396_p11 = pneg %p1395_p8 }
  0x28   : > { %p1403_p10 = pnand %p1402_p5, %p1396_p11 }
  0x2a   : > { %1406 = shalt.err (!%p1403_p10)
}
  0x2b   : > { %s1509_s10 = smov 128   ;;  %s1510_s15 = smov 8  }
  0x2c   : > { %1324 = dma.hbm_to_vmem [thread:$0]  (!%p1616_p12), %s1816_s1, 2048, %s219_s16, [#allocation4], %s1509_s10, %s1509_s10, %s1510_s15  }
  0x2d   : > { %s1407_s23 = scalar_lea.hbm %s1817_s2, 6144 }
  0x2e   : > { %p1408_p13 = scmp.ne.s32.totalorder %s1817_s2, %s1407_s23  ;;  %p1414_p9 = scmp.lt.u32.totalorder %s1407_s23, %s1817_s2 }
  0x30   : > { %p1410_p5 = pnand %p1408_p13, %p1381_p0 }
  0x32   : > { %p1411_p6 = pneg %p1410_p5 }
  0x34   : > { %p1416_p10 = pnand %p1414_p9, %p1411_p6 }
  0x36   : > { %1419 = shalt.err (!%p1416_p10)
}
  0x37   : > { %s1420_s16 = scalar_lea.vmem %s1620_s19, 6144  ;;  %p1428_p4 = scmp.lt.s32.totalorder %s1620_s19, %s1620_s19 }
  0x38   : > { %p1421_p1 = scmp.ne.s32.totalorder %s1620_s19, %s1420_s16  ;;  %p1429_p7 = scmp.lt.s32.totalorder %s1420_s16, %s1420_s16 }
  0x3a   : > { %p1423_p2 = pnand %p1421_p1, %p1381_p0  ;;  %p1430_p8 = por %p1429_p7, %p1428_p4 }
  0x3c   : > { %p1424_p3 = pneg %p1423_p2 }
  0x3e   : > { %p1431_p11 = pnand %p1430_p8, %p1424_p3 }
  0x40   : > { %1434 = shalt.err (!%p1431_p11)
}
  0x41   : > { %1327 = dma.hbm_to_vmem [thread:$0]  (!%p1616_p12), %s1817_s2, 6144, %s1620_s19, [#allocation7], %s1509_s10, %s1509_s10, %s1510_s15  }
  0x42   : > { %p1830_p13 = scmp.ne.s32.totalorder %s1828_s14, 0 }
  0x43   : > { %p1831_p5 = scmp.eq.s32.totalorder (!%p1830_p13), %s1580_s6, 0 }
  0x44   : > { %266 = sbr.rel (%p1830_p13) target bundleno = 974 (0x3ce), region = 48 }
  0x4b   : > { %1480 = dma.done.wait (%p1831_p5), [#allocation4], 2048   ;;  %p1832_p0 = pmov %p1831_p5 }
  0x4d   : > { %1482 = vsyncadd (%p1832_p0), [#allocation4], 4294965248  ;;  %p1833_p6 = pmov %p1832_p0 }
  0x4e   : > { %p1834_p9 = pmov %p1832_p0 }
  0x4f   : > { %1484 = dma.done.wait (%p1833_p6), [#allocation7], 6144  }
  0x50   : > { %1486 = vsyncadd (%p1834_p9), [#allocation7], 4294961152  ;;  %p301_p10 = scmp.lt.s32.totalorder %s1580_s6, 1  ;;  %v1511_v0 = vmov 0.0   ;;  %vm1512_vm0 = vmmov 0   ;;  %v1513_v1 = vmov 0  }
  0x51   : > { %1114 = vmatprep.subr.mxu0 %v1511_v0  ;;  %1116 = vmatprep.mubr.msk.f32.mxu0 %vm1512_vm0, %v1511_v0  ;;  %v1514_v2 = vmov 0.0|0.0   ;;  %vm344_vm1 = vcmask 1043456   ;;  %vm340_vm2 = vcmask 31744   ;;  %v322_v4 = vld [vmem:[%s1818_s3] sm:$0xf]  ;;  %v307_v8 = vld [vmem:[#allocation3 + $0x8] sm:$0xff] }
  0x52   : > { %s302_s14 = scalar_select %p301_p10, %s1580_s6, 1  ;;  %1377 = vset.pattern.permute.xlu0 %v1513_v1  ;;  %1239 = vmatprep.subr.bf16.mxu1 %v1514_v2  ;;  %v323_v5 = vld [vmem:[%s1820_s5] sm:$0xf]  ;;  %v1036_v6 = vld [vmem:[%s1820_s5 + $0x4] sm:$0xf]  ;;  %v308_v9 = vld [vmem:[#allocation3 + $0x10] sm:$0xff] }
  0x53   : > { %1151 = vmatprep.mubr.msk.f32.mxu1 %vm1512_vm0, %v1511_v0  ;;  %1378 = vset.pattern.permute.xlu1 %v1513_v1  ;;  %v306_v7 = vld [vmem:[#allocation3] sm:$0xff]  ;;  %v309_v10 = vld [vmem:[#allocation3 + $0x18] sm:$0xff]  ;;  %v1039_v13 = vld [vmem:[%s1820_s5 + $0x10] sm:$0xf]  ;;  %s298_s9 = sand.u32 1, %s1497_s27   ;;  %s1052_s18 = sshll.u32 %s1580_s6, 6 }
  0x54   : > { %s1035_s17 = sshll.u32 %s302_s14, 2  ;;  %337 = vperm.xlu0 %1377, %v323_v5   ;;  %v1240_v11 = vpack.c.bf16 %v307_v8, %v306_v7  ;;  %v1243_v12 = vpack.c.bf16 %v309_v10, %v308_v9  ;;  %v310_v14 = vld [vmem:[#allocation3 + $0x20] sm:$0xff]  ;;  %v311_v15 = vld [vmem:[#allocation3 + $0x28] sm:$0xff]  ;;  %v312_v17 = vld [vmem:[#allocation3 + $0x30] sm:$0xff]  ;;  %s1034_s16 = sshll.u32 %s298_s9, 2 }
  0x55   : > { %s304_s15 = scalar_lea.vmem %s1815_s0, %s1035_s17  ;;  %v1246_v16 = vpack.c.bf16 %v311_v15, %v310_v14  ;;  %v313_v18 = vld [vmem:[#allocation3 + $0x38] sm:$0xff]  ;;  %v314_v20 = vld [vmem:[#allocation3 + $0x40] sm:$0xff]  ;;  %v315_v21 = vld [vmem:[#allocation3 + $0x48] sm:$0xff]  ;;  %s300_s20 = scalar_lea.vmem [#allocation8], %s1034_s16 }
  0x56   : > { %v1690_v3 = vld [vmem:[%s304_s15] sm:$0xf]  ;;  %1241 = vmatpush3.bf16.msra.mxu1 %v1240_v11  ;;  %v1249_v19 = vpack.c.bf16 %v313_v18, %v312_v17  ;;  %v1252_v22 = vpack.c.bf16 %v315_v21, %v314_v20  ;;  %v316_v23 = vld [vmem:[#allocation3 + $0x50] sm:$0xff]  ;;  %v317_v24 = vld [vmem:[#allocation3 + $0x58] sm:$0xff]  ;;  %s305_s15 = sld [smem:[#allocation2]]  ;;  %s945_s14 = sshll.u32 %s300_s20, 4  ;;  %s1775_s14 = int_to_ptr.vmem [resolvable:$true] %s945_s14 }
  0x57   : > { %1115 = vmatpush3.msk.msra.mxu0 %vm344_vm1, %v1690_v3  ;;  %1242 = vmatprep.subr.bf16.mxu1 %v1514_v2  ;;  %v1255_v25 = vpack.c.bf16 %v317_v24, %v316_v23  ;;  %v318_v26 = vld [vmem:[#allocation3 + $0x60] sm:$0xff]  ;;  %v319_v27 = vld [vmem:[#allocation3 + $0x68] sm:$0xff]  ;;  %v320_v29 = vld [vmem:[#allocation3 + $0x70] sm:$0xff]  ;;  %s1773_s10 = scalar_lea.hbm %s1822_s7, %s1052_s18  ;;  %s1435_s21 = scalar_lea.vmem %s1775_s14, 64 }
  0x58   : > { %1117 = vmatmul.mubr.msk.f32.vlgmr.msra.gmra.mrb[0].mxu0 %vm340_vm2, %v322_v4  ;;  %1263 = vmatprep.subr.bf16.mxu0 %v1514_v2  ;;  %v1258_v28 = vpack.c.bf16 %v319_v27, %v318_v26  ;;  %v321_v30 = vld [vmem:[#allocation3 + $0x78] sm:$0xff]  ;;  %v1037_v32 = vld [vmem:[%s1820_s5 + $0x8] sm:$0xf]  ;;  %v504_v33 = vld [vmem:[#allocation6] sm:$0xff]  ;;  %p1436_p12 = scmp.ne.s32.totalorder %s1775_s14, %s1435_s21  ;;  %p1835_p1 = scmp.ne.s32.totalorder %s1826_s12, 0 }
  0x59   : > { %1186 = vmatprep.mubr.msk.f32.mxu0 %vm1512_vm0, %v1511_v0  ;;  %490 = vperm.xlu0 %1377, %v1036_v6   ;;  %v1261_v31 = vpack.c.bf16 %v321_v30, %v320_v29  ;;  %v505_v34 = vld [vmem:[#allocation6 + $0x8] sm:$0xff]  ;;  %v506_v37 = vld [vmem:[#allocation6 + $0x10] sm:$0xff]  ;;  %v507_v38 = vld [vmem:[#allocation6 + $0x18] sm:$0xff]  ;;  %s1515_s6 = smov [#allocation8]  }
  0x5a   : > { %1244 = vmatpush3.bf16.msra.mxu1 %v1243_v12  ;;  %496 = vperm.xlu1 %1378, %v1037_v32   ;;  %v1038_v35 = vld [vmem:[%s1820_s5 + $0xc] sm:$0xf]  ;;  %v1264_v36 = vpack.c.bf16 %v505_v34, %v504_v33  ;;  %v1267_v39 = vpack.c.bf16 %v507_v38, %v506_v37  ;;  %v508_v40 = vld [vmem:[#allocation6 + $0x20] sm:$0xff]  ;;  %v1040_v42 = vld [vmem:[%s1820_s5 + $0x14] sm:$0xf]  ;;  %p1437_p2 = pnand %p1436_p12, %p1835_p1  ;;  %s1439_s22 = sshll.u32 %s1515_s6, 4  ;;  %s1440_s22 = int_to_ptr.vmem [resolvable:$false] %s1439_s22 }
  0x5b   : > { %1245 = vmatprep.subr.bf16.mxu1 %v1514_v2  ;;  %v509_v41 = vld [vmem:[#allocation6 + $0x28] sm:$0xff]  ;;  %v510_v44 = vld [vmem:[#allocation6 + $0x30] sm:$0xff]  ;;  %v511_v45 = vld [vmem:[#allocation6 + $0x38] sm:$0xff]  ;;  %s1441_s23 = scalar_lea.vmem %s1440_s22, 128  ;;  %p1442_p4 = scmp.lt.s32.totalorder %s1775_s14, %s1440_s22 }
  0x5c   : > { %1265 = vmatpush3.bf16.msra.mxu0 %v1264_v36  ;;  %v1270_v43 = vpack.c.bf16 %v509_v41, %v508_v40  ;;  %v1273_v46 = vpack.c.bf16 %v511_v45, %v510_v44  ;;  %v512_v47 = vld [vmem:[#allocation6 + $0x40] sm:$0xff]  ;;  %v513_v48 = vld [vmem:[#allocation6 + $0x48] sm:$0xff]  ;;  %v514_v50 = vld [vmem:[#allocation6 + $0x50] sm:$0xff]  ;;  %p1438_p3 = pneg %p1437_p2  ;;  %p1443_p7 = scmp.lt.s32.totalorder %s1441_s23, %s1435_s21 }
  0x5d   : > { %919 = vperm.xlu0 %1377, %v1039_v13   ;;  %1266 = vmatprep.subr.bf16.mxu0 %v1514_v2  ;;  %v1276_v49 = vpack.c.bf16 %v513_v48, %v512_v47  ;;  %v515_v51 = vld [vmem:[#allocation6 + $0x58] sm:$0xff]  ;;  %v746_v53 = vld [vmem:[#allocation6 + $0x100] sm:$0xff]  ;;  %v747_v54 = vld [vmem:[#allocation6 + $0x108] sm:$0xff] }
  0x5e   : > { %1247 = vmatpush3.bf16.msra.mxu1 %v1246_v16  ;;  %913 = vperm.xlu1 %1378, %v1038_v35   ;;  %v1279_v52 = vpack.c.bf16 %v515_v51, %v514_v50  ;;  %v1288_v57 = vpack.c.bf16 %v747_v54, %v746_v53  ;;  %v748_v60 = vld [vmem:[#allocation6 + $0x110] sm:$0xff]  ;;  %v749_v61 = vld [vmem:[#allocation6 + $0x118] sm:$0xff]  ;;  %v750_v63 = vld [vmem:[#allocation6 + $0x120] sm:$0xff]  ;;  %p1444_p8 = por %p1443_p7, %p1442_p4 }
  0x5f   : > { %1248 = vmatprep.subr.bf16.mxu1 %v1514_v2  ;;  %v1291_v62 = vpack.c.bf16 %v749_v61, %v748_v60  ;;  %v751_v1 = vld [vmem:[#allocation6 + $0x128] sm:$0xff]  ;;  %v752_v5 = vld [vmem:[#allocation6 + $0x130] sm:$0xff]  ;;  %v753_v6 = vld [vmem:[#allocation6 + $0x138] sm:$0xff] }
  0x60   : > { %1268 = vmatpush3.bf16.msra.mxu0 %v1267_v39  ;;  %v1294_v4 = vpack.c.bf16 %v751_v1, %v750_v63  ;;  %v1297_v7 = vpack.c.bf16 %v753_v6, %v752_v5  ;;  %v754_v8 = vld [vmem:[#allocation6 + $0x140] sm:$0xff]  ;;  %v755_v9 = vld [vmem:[#allocation6 + $0x148] sm:$0xff]  ;;  %v756_v11 = vld [vmem:[#allocation6 + $0x150] sm:$0xff]  ;;  %p1445_p11 = pnand %p1444_p8, %p1438_p3 }
  0x61   : > { %1269 = vmatprep.subr.bf16.mxu0 %v1514_v2  ;;  %v1300_v10 = vpack.c.bf16 %v755_v9, %v754_v8  ;;  %v757_v12 = vld [vmem:[#allocation6 + $0x158] sm:$0xff]  ;;  %v516_v14 = vld [vmem:[#allocation6 + $0x60] sm:$0xff]  ;;  %v517_v15 = vld [vmem:[#allocation6 + $0x68] sm:$0xff] }
  0x62   : > { %1250 = vmatpush3.bf16.msra.mxu1 %v1249_v19  ;;  %925 = vperm.xlu1 %1378, %v1040_v42   ;;  %v1303_v13 = vpack.c.bf16 %v757_v12, %v756_v11  ;;  %v1282_v16 = vpack.c.bf16 %v517_v15, %v516_v14  ;;  %v758_v17 = vld [vmem:[#allocation6 + $0x160] sm:$0xff]  ;;  %v759_v18 = vld [vmem:[#allocation6 + $0x168] sm:$0xff]  ;;  %v518_v20 = vld [vmem:[#allocation6 + $0x70] sm:$0xff] }
  0x63   : > { %1251 = vmatprep.subr.bf16.mxu1 %v1514_v2  ;;  %v1306_v19 = vpack.c.bf16 %v759_v18, %v758_v17  ;;  %v519_v21 = vld [vmem:[#allocation6 + $0x78] sm:$0xff]  ;;  %v760_v23 = vld [vmem:[#allocation6 + $0x170] sm:$0xff]  ;;  %v590_v35 = vld [vmem:[%s1819_s4] sm:$0xf] }
  0x64   : > { %1271 = vmatpush3.bf16.msra.mxu0 %v1270_v43  ;;  %v761_v24 = vld [vmem:[#allocation6 + $0x178] sm:$0xff]  ;;  %v1048_v40 = vld [vmem:[%s1819_s4 + $0x8] sm:$0xf] }
  0x65   : > { %1272 = vmatprep.subr.bf16.mxu0 %v1514_v2 }
  0x66   : > { %1253 = vmatpush3.bf16.msra.mxu1 %v1252_v22  ;;  %v1285_v22 = vpack.c.bf16 %v519_v21, %v518_v20 }
  0x67   : > { %1254 = vmatprep.subr.bf16.mxu1 %v1514_v2 }
  0x68   : > { %1274 = vmatpush3.bf16.msra.mxu0 %v1273_v46 }
  0x69   : > { %1275 = vmatprep.subr.bf16.mxu0 %v1514_v2 }
  0x6a   : > { %1256 = vmatpush3.bf16.msra.mxu1 %v1255_v25  ;;  %v1309_v25 = vpack.c.bf16 %v761_v24, %v760_v23 }
  0x6b   : > { %1257 = vmatprep.subr.bf16.mxu1 %v1514_v2 }
  0x6c   : > { %1277 = vmatpush3.bf16.msra.mxu0 %v1276_v49 }
  0x6d   : > { %1278 = vmatprep.subr.bf16.mxu0 %v1514_v2 }
  0x6e   : > { %1259 = vmatpush3.bf16.msra.mxu1 %v1258_v28 }
  0x6f   : > { %1260 = vmatprep.subr.bf16.mxu1 %v1514_v2 }
  0x70   : > { %1280 = vmatpush3.bf16.msra.mxu0 %v1279_v52 }
  0x71   : > { %1281 = vmatprep.subr.bf16.mxu0 %v1514_v2 }
  0x72   : > { %1262 = vmatpush3.bf16.msra.mxu1 %v1261_v31  ;;  %v501_v31 = vstv %s305_s15  ;;  %s932_s15 = scalar_lea.sflag [#allocation5], %s298_s9 }
  0x73   : > { %1287 = vmatprep.subr.bf16.mxu1 %v1514_v2 }
  0x74   : > { %1283 = vmatpush3.bf16.msra.mxu0 %v1282_v16 }
  0x75   : > { %1284 = vmatprep.subr.bf16.mxu0 %v1514_v2 }
  0x78   : > { %1286 = vmatpush3.bf16.msra.mxu0 %v1285_v22 }
  0x79   : > { %1189 = vmatprep.subr.mxu0 %v1511_v0 }
  0xd3   : > { %v338_v55 = vpop.permute.xlu0 %337 }
  0xd8   : > { %v491_v26 = vpop.permute.xlu0 %490 }
  0xd9   : > { %v497_v30 = vpop.permute.xlu1 %496 }
  0xdc   : > { %v920_v50 = vpop.permute.xlu0 %919 }
  0xdd   : > { %v914_v46 = vpop.permute.xlu1 %913 }
  0xe1   : > { %v926_v52 = vpop.permute.xlu1 %925 }
 0x12b   : > { %v414_v56 = vpop.f32.mrb[0].mxu0 }
 0x12c   : > { %v415_v58 = vadd.f32 %v414_v56, %v338_v55  ;;  %v1118_v59 = vpop.f32.mrb[1].mxu0 }
 0x12e   : > { %1152 = vmatmul.mubr.f32.vlgmr.msra.gmra.mrb[0].mxu1 %v415_v58 }
 0x12f   : > { %1289 = vmatpush3.bf16.msra.mxu1 %v1288_v57  ;;  %1231 = vmatprep.mubr.msk.f32.mxu1 %vm1512_vm0, %v1511_v0 }
 0x130   : > { %1290 = vmatprep.subr.bf16.mxu1 %v1514_v2 }
 0x133   : > { %1292 = vmatpush3.bf16.msra.mxu1 %v1291_v62 }
 0x134   : > { %1293 = vmatprep.subr.bf16.mxu1 %v1514_v2 }
 0x137   : > { %1295 = vmatpush3.bf16.msra.mxu1 %v1294_v4 }
 0x138   : > { %1296 = vmatprep.subr.bf16.mxu1 %v1514_v2 }
 0x13b   : > { %1298 = vmatpush3.bf16.msra.mxu1 %v1297_v7 }
 0x13c   : > { %1299 = vmatprep.subr.bf16.mxu1 %v1514_v2 }
 0x13f   : > { %1301 = vmatpush3.bf16.msra.mxu1 %v1300_v10 }
 0x140   : > { %1302 = vmatprep.subr.bf16.mxu1 %v1514_v2 }
 0x143   : > { %1304 = vmatpush3.bf16.msra.mxu1 %v1303_v13 }
 0x144   : > { %1305 = vmatprep.subr.bf16.mxu1 %v1514_v2 }
 0x147   : > { %1307 = vmatpush3.bf16.msra.mxu1 %v1306_v19 }
 0x148   : > { %1308 = vmatprep.subr.bf16.mxu1 %v1514_v2  ;;  %v1043_v2 = vld [vmem:[%s1819_s4 + $0x4] sm:$0xf] }
 0x14b   : > { %1310 = vmatpush3.bf16.msra.mxu1 %v1309_v25 }
 0x201   : > { %v484_v27 = vpop.f32.mrb[0].mxu1 }
 0x202   : > { %v493_v28 = vmul.f32 %v491_v26, %v484_v27  ;;  %v1153_v29 = vpop.f32.mrb[1].mxu1 }
 0x204   : > { %v499_v32 = vadd.f32 %v497_v30, %v493_v28 }
 0x206   : > { %v502_v33 = vmul.f32 %v501_v31, %v499_v32  ;;  %vm500_vm3 = vcmp.ge.f32.partialorder %v499_v32, 0.0 }
 0x208   : > { %v503_v34 = vsel %vm500_vm3, %v499_v32, %v502_v33 }
 0x209   : > { %1187 = vmatmul.mubr.f32.vlgmr.msra.gmra.mrb[2].mxu0 %v503_v34  ;;  %1232 = vmatmul.mubr.f32.vlgmr.msra.gmra.mrb[2].mxu1 %v503_v34 }
 0x20a   : > { %1190 = vmatpush3.msk.msra.mxu0 %vm344_vm1, %v503_v34  ;;  %1191 = vmatprep.mubr.msk.f32.mxu0 %vm1512_vm0, %v1511_v0 }
 0x20b   : > { %1194 = vmatprep.subr.mxu0 %v1511_v0 }
 0x20d   : > { %1192 = vmatmul.mubr.msk.f32.vlgmr.msra.gmra.mrb[4].mxu0 %vm340_vm2, %v1043_v2 }
 0x20e   : > { %1196 = vmatprep.mubr.msk.f32.mxu0 %vm1512_vm0, %v1511_v0 }
 0x2dc   : > { %v586_v36 = vpop.f32.mrb[2].mxu0  ;;  %v828_v37 = vpop.f32.mrb[2].mxu1 }
 0x2dd   : > { %v1188_v38 = vpop.f32.mrb[3].mxu0  ;;  %1195 = vmatpush3.msk.msra.mxu0 %vm344_vm1, %v586_v36  ;;  %v1233_v39 = vpop.f32.mrb[3].mxu1 }
 0x2de   : > { %1197 = vmatmul.mubr.msk.f32.vlgmr.msra.gmra.mrb[6].mxu0 %vm340_vm2, %v590_v35  ;;  %1234 = vmatprep.subr.mxu0 %v1511_v0 }
 0x2df   : > { %1235 = vmatpush3.msk.msra.mxu0 %vm344_vm1, %v828_v37  ;;  %1236 = vmatprep.mubr.msk.f32.mxu0 %vm1512_vm0, %v1511_v0 }
 0x2e0   : > { %v665_v41 = vpop.f32.mrb[4].mxu0 }
 0x2e1   : > { %v1193_v42 = vpop.f32.mrb[5].mxu0 }
 0x2e2   : > { %1237 = vmatmul.mubr.msk.f32.vlgmr.msra.gmra.mrb[8].mxu0 %vm340_vm2, %v1048_v40 }
 0x3b1   : > { %v741_v43 = vpop.f32.mrb[6].mxu0 }
 0x3b2   : > { %v742_v44 = vadd.f32 %v741_v43, %v665_v41  ;;  %v1198_v45 = vpop.f32.mrb[7].mxu0 }
 0x3b5   : > { %v906_v47 = vpop.f32.mrb[8].mxu0 }
 0x3b6   : > { %v910_v48 = vadd.f32 %v906_v47, %v742_v44  ;;  %v1238_v49 = vpop.f32.mrb[9].mxu0 }
 0x3b8   : > { %v916_v0 = vadd.f32 %v914_v46, %v910_v48 }
 0x3ba   : > { %v922_v51 = vmul.f32 %v920_v50, %v916_v0 }
 0x3bc   : > { %v928_v53 = vadd.f32 %v926_v52, %v922_v51 }
 0x3be   : > { %v929_v54 = vadd.f32 %v928_v53, %v1690_v3 }
 0x3c0   : > { %930 = vst [vmem:[%s300_s20] sm:$0xf] %v929_v54 }
 0x3c1   : > { %1448 = shalt.err (!%p1445_p11)
}
 0x3c2   : > { %s1449_s24 = scalar_lea.hbm %s1773_s10, 64  ;;  %s1453_s9 = scalar_lea.hbm %s1822_s7, 128 }
 0x3c3   : > { %p1450_p13 = scmp.ne.s32.totalorder %s1773_s10, %s1449_s24  ;;  %p1454_p6 = scmp.lt.u32.totalorder %s1773_s10, %s1822_s7 }
 0x3c4   : > { %p1455_p9 = scmp.lt.u32.totalorder %s1453_s9, %s1449_s24  ;;  %p1457_p12 = scmp.lt.u32.totalorder %s1449_s24, %s1773_s10 }
 0x3c5   : > { %p1451_p5 = pnand %p1450_p13, %p1835_p1 }
 0x3c6   : > { %p1456_p10 = por %p1455_p9, %p1454_p6 }
 0x3c7   : > { %p1452_p0 = pneg %p1451_p5 }
 0x3c8   : > { %p1458_p2 = por %p1457_p12, %p1456_p10 }
 0x3ca   : > { %p1459_p3 = pnand %p1458_p2, %p1452_p0 }
 0x3cc   : > { %1462 = shalt.err (!%p1459_p3)
}
 0x3cd   : > { %1319 = dma.vmem_to_hbm [thread:$0]  (%p1835_p1), %s1775_s14, 64, %s1773_s10, %s932_s15  }
 0x3ce PF: > { %p1336_p4 = scmp.ge.s32.totalorder %s1505_s29, 2  ;;  %s957_s20 = sand.u32 1, %s1493_s26  }
 0x3cf   : > { %p1836_p7 = scmp.ne.s32.totalorder %s1827_s13, 0  ;;  %s958_s17 = scalar_lea.sflag [#allocation5], %s957_s20 }
 0x3d1   : > { %p1329_p8 = pnand %p1336_p4, %p1836_p7 }
 0x3d3   : > { %1488 = dma.done.wait (!%p1329_p8), %s958_s17, 64  }
 0x3d4   : > { %1490 = vsyncadd (!%p1329_p8), %s958_s17, 4294967232  ;;  %p20_p11 = scmp.ge.s32.totalorder %s1584_s8, 4   ;;  %s1837_s26 = smov %s1497_s27 }
 0x3d5   : > { %s1838_s27 = smov %s1501_s28  ;;  %s1839_s28 = smov %s1595_s11 }
 0x3d6   : > { %s1840_s29 = smov %s1584_s8  ;;  %22 = sbr.rel (!%p20_p11) target bundleno = 7 (0x7), region = 100 }
 0x3dd   :  { %963 = vsyncpa [#allocation4], 1 }
 0x3de   :  { %965 = vsyncpa [#allocation4 + $0x1], 1 }
 0x3df   :  { %966 = vsyncpa [#allocation7], 1 }
 0x3e0   :  { %967 = vsyncpa [#allocation5], 1 }
 0x3e1   :  { %969 = vsyncpa [#allocation5 + $0x1], 1 }

</bundles_post_ra>
